<compile_context>
chip_gen: v5e
topology: v5e:2x2
jax: 0.10.0
libtpu: 0.0.40
codegen_flags: <defaults>
</compile_context>

<pallas_src>
import functools
import math

import jax
import jax.numpy as jnp
from jax import lax
from jax.experimental import pallas as pl
from jax.experimental.pallas import tpu as pltpu


def _round_up(a, m):
    return -(-a // m) * m


def _vmem_limit_bytes():
    """Generation-aware scoped-VMEM limit: ~75% of per-core capacity, capped at
    100 MiB (v5e/v6e); conservative 48 MiB fallback (safe even on v7x 64 MiB)."""
    cap = 64 << 20
    try:
        cap = int(pltpu.get_tpu_info().vmem_capacity_bytes)
    except Exception:  # query unavailable -> assume smallest (v7x) per-core VMEM
        pass
    return max(32 << 20, min(int(cap * 0.75), 100 << 20))


def double_conv_kernel(x_ref, w1_ref, b1_ref, w2_ref, b2_ref, o_ref, *,
                       seg_len, valid_len, compute_dtype):
    """One grid step: (Bt, C_in, n) -> (Bt, C_out, n), two fused conv+BN+ReLU."""
    bt = x_ref.shape[0]
    n = x_ref.shape[-1]

    # Boundary masks along the lane axis, computed once and shared by both convs.
    # `seg_len` is the per-element segment length (collapse mode packs several
    # length-seg_len segments into one lane axis); only the first `valid_len`
    # positions of each segment hold real data.
    pos = lax.broadcasted_iota(jnp.int32, (1, n), 1) % seg_len
    left_edge = pos == 0
    right_edge = pos == valid_len - 1

    def stack_taps(h):                       # h: (C, n) in compute dtype
        h_lm1 = jnp.where(left_edge, jnp.zeros_like(h),
                          pltpu.roll(h, shift=1, axis=1))
        h_lp1 = jnp.where(right_edge, jnp.zeros_like(h),
                          pltpu.roll(h, shift=n - 1, axis=1))
        return jnp.concatenate([h_lm1, h, h_lp1], axis=0)      # (3C, n)

    def conv_bn_relu(h, w, bias):
        taps = stack_taps(h.astype(compute_dtype))
        acc = jnp.dot(w, taps, preferred_element_type=jnp.float32)  # one MXU call
        return jnp.maximum(acc + bias, 0.0)                         # f32 bias+ReLU

    w1 = w1_ref[...]
    b1 = b1_ref[...]
    w2 = w2_ref[...]
    b2 = b2_ref[...]
    for bi in range(bt):                    # static unroll; weights stay resident
        h = conv_bn_relu(x_ref[bi], w1, b1)     # (C_mid, n) f32
        y = conv_bn_relu(h, w2, b2)             # (C_out, n) f32
        o_ref[bi] = y.astype(o_ref.dtype)


def double_conv(x, w1, scale1, bias1, w2, scale2, bias2, *,
                compute_dtype=jnp.bfloat16):
    """x: (B, C_in, L); w1: (3, C_mid, C_in) tap-major; w2: (3, C_out, C_mid);
    scale/bias: (C, 1) folded (inference-mode) BatchNorm affine params.
    Output dtype == x.dtype (keep x in bf16 to stay bf16 end-to-end)."""
    B, C_in, L = x.shape
    C_mid = w1.shape[1]
    C_out = w2.shape[1]

    # Sublane-align channel dims (multiples of 8); zero-width pads are free.
    C_in_p = _round_up(C_in, 8)
    C_mid_p = _round_up(C_mid, 8)
    C_out_p = _round_up(C_out, 8)

    io_sz = jnp.dtype(x.dtype).itemsize
    cd_sz = jnp.dtype(compute_dtype).itemsize

    # ---- host-side parameter prep: fold BN scale into weights, pad channels,
    #      fuse the 3 taps, cast to the MXU compute dtype ----
    w1s = (w1 * scale1[None]).astype(jnp.float32)
    w2s = (w2 * scale2[None]).astype(jnp.float32)
    w1p = jnp.zeros((3, C_mid_p, C_in_p), jnp.float32).at[:, :C_mid, :C_in].set(w1s)
    w2p = jnp.zeros((3, C_out_p, C_mid_p), jnp.float32).at[:, :C_out, :C_mid].set(w2s)
    w1f = w1p.transpose(1, 0, 2).reshape(C_mid_p, 3 * C_in_p).astype(compute_dtype)
    w2f = w2p.transpose(1, 0, 2).reshape(C_out_p, 3 * C_mid_p).astype(compute_dtype)
    b1p = jnp.zeros((C_mid_p, 1), jnp.float32).at[:C_mid].set(bias1.astype(jnp.float32))
    b2p = jnp.zeros((C_out_p, 1), jnp.float32).at[:C_out].set(bias2.astype(jnp.float32))

    # ---- VMEM budget -> max lane-columns per grid step ----
    vmem_limit = _vmem_limit_bytes()
    weight_bytes = (w1f.size + w2f.size) * cd_sz + (b1p.size + b2p.size) * 4
    # TODO(synk): single-buffer the constant weight operands (pipeline_mode=
    # pl.Buffered(1)) to reclaim one weight copy of VMEM for very large channels.
    per_col = (2 * (C_in_p + C_out_p) * io_sz        # double-buffered in/out blocks
               + 4 * (C_in_p + C_mid_p) * cd_sz      # tap slabs + roll temporaries
               + (C_mid_p + C_out_p) * 4)            # f32 accumulators (h, y)
    budget = int(vmem_limit * 0.75) - 2 * weight_bytes
    max_cols = max(128, budget // max(per_col, 1))

    # ---- layout selection ----
    # "direct": blocks are (Bt, C, Lp) straight from HBM (no host transposes);
    #           needs Lp % 128 == 0 for lane-dense stores (pad L if needed).
    # "collapse": small L not a multiple of 128 -> fold Bt batch elements into
    #           the lane axis (host reshuffle) so every store is lane-dense.
    if L % 128 == 0:
        direct, Lp = True, L
    else:
        base = 128 // math.gcd(L, 128)
        Lp128 = _round_up(L, 128)
        if base * L <= max_cols and Lp128 > 2 * L:
            direct, Lp = False, L
        else:
            direct, Lp = True, Lp128      # bounded waste; avoids pathological Bt

    if direct:
        bt = max(1, min(max_cols // Lp, 16))          # cap static unroll depth
        if B >= 2:
            bt = min(bt, _round_up(B, 2) // 2)        # keep G >= 2 (v7x megacore)
        bt = max(1, min(bt, B))
        B_pad = _round_up(B, bt)
        G = B_pad // bt
        xk = jnp.pad(x, ((0, B_pad - B), (0, C_in_p - C_in), (0, Lp - L)))
        bt_block, lane_len, seg_len = bt, Lp, Lp
        # TODO(synk): for very large L (Lp > max_cols), tile the lane axis with a
        # radius-1 halo instead of processing a whole row per grid step.
    else:
        groups_needed = -(-B // base)
        mult = max(1, min(max_cols // (base * L), groups_needed))
        if groups_needed >= 2:
            mult = min(mult, max(1, groups_needed // 2))   # keep G >= 2
        Bt = base * mult
        B_pad = _round_up(B, Bt)
        G = B_pad // Bt
        N = Bt * L
        xp = jnp.pad(x, ((0, B_pad - B), (0, C_in_p - C_in), (0, 0)))
        # (B_pad, C, L) -> (G, C, Bt*L): lane axis is batch-major inside a group.
        xk = xp.reshape(G, Bt, C_in_p, L).transpose(0, 2, 1, 3).reshape(G, C_in_p, N)
        # TODO(synk): fold this batch->lane flatten into the kernel (in-VMEM) to
        # drop the extra HBM transpose pass over x and y for small, odd L.
        bt_block, lane_len, seg_len = 1, N, L

    kernel = functools.partial(double_conv_kernel, seg_len=seg_len, valid_len=L,
                               compute_dtype=compute_dtype)

    grid_spec = pltpu.PrefetchScalarGridSpec(
        num_scalar_prefetch=0,
        grid=(G,),
        in_specs=[
            pl.BlockSpec((bt_block, C_in_p, lane_len), lambda g: (g, 0, 0)),
            pl.BlockSpec((C_mid_p, 3 * C_in_p), lambda g: (0, 0)),
            pl.BlockSpec((C_mid_p, 1), lambda g: (0, 0)),
            pl.BlockSpec((C_out_p, 3 * C_mid_p), lambda g: (0, 0)),
            pl.BlockSpec((C_out_p, 1), lambda g: (0, 0)),
        ],
        out_specs=pl.BlockSpec((bt_block, C_out_p, lane_len), lambda g: (g, 0, 0)),
    )
    yk = pl.pallas_call(
        kernel,
        out_shape=jax.ShapeDtypeStruct((G * bt_block, C_out_p, lane_len), x.dtype),
        grid_spec=grid_spec,
        compiler_params=pltpu.CompilerParams(
            dimension_semantics=("parallel",),
            vmem_limit_bytes=int(vmem_limit)),
    )(xk, w1f, b1p, w2f, b2p)

    if direct:
        return yk[:B, :C_out, :L]
    y = (yk.reshape(G, C_out_p, Bt, L).transpose(0, 2, 1, 3)
           .reshape(B_pad, C_out_p, L))
    return y[:B, :C_out, :]


def _fold_bn(gamma, beta, running_mean, running_var, eps=1e-5):
    scale = gamma / jnp.sqrt(running_var + eps)
    bias = beta - running_mean * scale
    return scale[:, None], bias[:, None]


def _reference(x, w1_kcoci, s1, b1, w2_kcoci, s2, b2):
    """Pure-JAX reference (lax conv) for correctness check."""
    def conv(h, w_kcoci):
        w = jnp.transpose(w_kcoci, (1, 2, 0))      # (3, Cout, Cin) -> (Cout, Cin, K)
        return lax.conv_general_dilated(
            h, w, window_strides=(1,), padding=((1, 1),),
            dimension_numbers=("NCH", "OIH", "NCH"))
    h = jnp.maximum(conv(x, w1_kcoci) * s1[None] + b1[None], 0.0)
    y = jnp.maximum(conv(h, w2_kcoci) * s2[None] + b2[None], 0.0)
    return y


def _run_case(key, B, C_in, C_out, L, compute_dtype, atol, rtol):
    C_mid = C_out  # default mid_channels = out_channels
    ks = jax.random.split(key, 8)
    x = jax.random.normal(ks[0], (B, C_in, L), dtype=jnp.float32)
    w1 = jax.random.normal(ks[1], (3, C_mid, C_in), dtype=jnp.float32) * 0.2
    w2 = jax.random.normal(ks[2], (3, C_out, C_mid), dtype=jnp.float32) * 0.2
    g1 = 1.0 + 0.1 * jax.random.normal(ks[3], (C_mid,), dtype=jnp.float32)
    be1 = 0.1 * jax.random.normal(ks[4], (C_mid,), dtype=jnp.float32)
    rm1 = 0.05 * jax.random.normal(ks[5], (C_mid,), dtype=jnp.float32)
    rv1 = jnp.ones((C_mid,), dtype=jnp.float32)
    g2 = 1.0 + 0.1 * jax.random.normal(ks[6], (C_out,), dtype=jnp.float32)
    be2 = 0.1 * jax.random.normal(ks[7], (C_out,), dtype=jnp.float32)
    rm2 = jnp.zeros((C_out,), dtype=jnp.float32)
    rv2 = jnp.ones((C_out,), dtype=jnp.float32)
    s1, b1 = _fold_bn(g1, be1, rm1, rv1)
    s2, b2 = _fold_bn(g2, be2, rm2, rv2)

    out = double_conv(x, w1, s1, b1, w2, s2, b2, compute_dtype=compute_dtype)
    out = jax.block_until_ready(out)
    ref = _reference(x, w1, s1, b1, w2, s2, b2)
    assert out.shape == (B, C_out, L)
    assert out.dtype == x.dtype
    err = float(jnp.max(jnp.abs(out - ref)))
    assert jnp.allclose(out, ref, atol=atol, rtol=rtol), (
        f"mismatch vs reference (max abs err {err})")


if __name__ == "__main__":
    key = jax.random.PRNGKey(0)
    k1, k2 = jax.random.split(key, 2)
    # Collapse layout (small, non-128-multiple L): exact f32 path + default bf16.
    _run_case(k1, B=2, C_in=4, C_out=8, L=16, compute_dtype=jnp.float32,
              atol=1e-4, rtol=1e-4)
    _run_case(k1, B=2, C_in=4, C_out=8, L=16, compute_dtype=jnp.bfloat16,
              atol=5e-2, rtol=5e-2)
    # Direct (transpose-free) layout: L multiple of 128, two grid groups.
    _run_case(k2, B=4, C_in=8, C_out=16, L=128, compute_dtype=jnp.float32,
              atol=1e-4, rtol=1e-4)
    _run_case(k2, B=4, C_in=8, C_out=16, L=128, compute_dtype=jnp.bfloat16,
              atol=5e-2, rtol=5e-2)
    print("KERNEL_OK")
</pallas_src>

<mosaic_0001>
module attributes {stable_mosaic.version = 11 : i64} {
  func.func @double_conv_kernel(%arg0: i32, %arg1: memref<1x8x128xf32, #tpu.memory_space<vmem>>, %arg2: memref<8x24xf32, #tpu.memory_space<vmem>>, %arg3: memref<8x1xf32, #tpu.memory_space<vmem>>, %arg4: memref<8x24xf32, #tpu.memory_space<vmem>>, %arg5: memref<8x1xf32, #tpu.memory_space<vmem>>, %arg6: memref<1x8x128xf32, #tpu.memory_space<vmem>>) attributes {dimension_semantics = [#tpu.dimension_semantics<parallel>], iteration_bounds = array<i64: 1>, scalar_prefetch = 0 : i64, scratch_operands = 0 : i64, tpu.core_type = #tpu.core_type<tc>, window_params = [{transform_indices = @transform_0, window_bounds = array<i64: 1, 8, 128>}, {pipeline_mode = #tpu.pipeline_mode<synchronous>, transform_indices = @transform_1, window_bounds = array<i64: 8, 24>}, {pipeline_mode = #tpu.pipeline_mode<synchronous>, transform_indices = @transform_2, window_bounds = array<i64: 8, 1>}, {pipeline_mode = #tpu.pipeline_mode<synchronous>, transform_indices = @transform_3, window_bounds = array<i64: 8, 24>}, {pipeline_mode = #tpu.pipeline_mode<synchronous>, transform_indices = @transform_4, window_bounds = array<i64: 8, 1>}, {transform_indices = @transform_5, window_bounds = array<i64: 1, 8, 128>}]} {
    %0 = tpu.iota {dimensions = array<i32: 1>} : vector<1x128xi32>
    %c16_i32 = arith.constant 16 : i32
    %c0_i32 = arith.constant 0 : i32
    %1 = arith.cmpi eq, %c16_i32, %c0_i32 : i32
    %c1_i32 = arith.constant 1 : i32
    %2 = arith.select %1, %c1_i32, %c16_i32 : i32
    %3 = vector.broadcast %2 : i32 to vector<1x128xi32>
    %4 = arith.remsi %0, %3 : vector<1x128xi32>
    %c0_i32_0 = arith.constant 0 : i32
    %5 = vector.broadcast %c0_i32_0 : i32 to vector<1x128xi32>
    %6 = arith.cmpi ne, %4, %5 : vector<1x128xi32>
    %c0_i32_1 = arith.constant 0 : i32
    %7 = vector.broadcast %c0_i32_1 : i32 to vector<1x128xi32>
    %8 = arith.cmpi slt, %4, %7 : vector<1x128xi32>
    %c0_i32_2 = arith.constant 0 : i32
    %9 = arith.cmpi slt, %2, %c0_i32_2 : i32
    %10 = vector.broadcast %9 : i1 to vector<1x128xi1>
    %11 = vector.broadcast %10 : vector<1x128xi1> to vector<1x128xi1>
    %12 = arith.xori %8, %11 : vector<1x128xi1>
    %13 = arith.andi %12, %6 : vector<1x128xi1>
    %14 = vector.broadcast %2 : i32 to vector<1x128xi32>
    %15 = arith.addi %4, %14 : vector<1x128xi32>
    %16 = arith.select %13, %15, %4 : vector<1x128xi1>, vector<1x128xi32>
    %c0_i32_3 = arith.constant 0 : i32
    %17 = vector.broadcast %c0_i32_3 : i32 to vector<1x128xi32>
    %18 = arith.cmpi eq, %16, %17 : vector<1x128xi32>
    %c15_i32 = arith.constant 15 : i32
    %19 = vector.broadcast %c15_i32 : i32 to vector<1x128xi32>
    %20 = arith.cmpi eq, %16, %19 : vector<1x128xi32>
    %c0 = arith.constant 0 : index
    %c0_4 = arith.constant 0 : index
    %21 = vector.load %arg2[%c0, %c0_4] : memref<8x24xf32, #tpu.memory_space<vmem>>, vector<8x24xf32>
    %c0_5 = arith.constant 0 : index
    %c0_6 = arith.constant 0 : index
    %22 = vector.load %arg3[%c0_5, %c0_6] : memref<8x1xf32, #tpu.memory_space<vmem>>, vector<8x1xf32>
    %c0_7 = arith.constant 0 : index
    %c0_8 = arith.constant 0 : index
    %23 = vector.load %arg4[%c0_7, %c0_8] : memref<8x24xf32, #tpu.memory_space<vmem>>, vector<8x24xf32>
    %c0_9 = arith.constant 0 : index
    %c0_10 = arith.constant 0 : index
    %24 = vector.load %arg5[%c0_9, %c0_10] : memref<8x1xf32, #tpu.memory_space<vmem>>, vector<8x1xf32>
    %c0_11 = arith.constant 0 : index
    %c0_12 = arith.constant 0 : index
    %c0_13 = arith.constant 0 : index
    %25 = vector.load %arg1[%c0_11, %c0_12, %c0_13] : memref<1x8x128xf32, #tpu.memory_space<vmem>>, vector<1x8x128xf32>
    %26 = vector.shape_cast %25 : vector<1x8x128xf32> to vector<8x128xf32>
    %cst = arith.constant 0.000000e+00 : f32
    %27 = vector.broadcast %cst : f32 to vector<8x128xf32>
    %c1_i32_14 = arith.constant 1 : i32
    %28 = tpu.dynamic_rotate %26 by %c1_i32_14 dim 1 : vector<8x128xf32>, i32 -> vector<8x128xf32>
    %29 = vector.shape_cast %18 : vector<1x128xi1> to vector<1x128xi1>
    %30 = vector.broadcast %29 : vector<1x128xi1> to vector<8x128xi1>
    %31 = arith.select %30, %27, %28 : vector<8x128xi1>, vector<8x128xf32>
    %cst_15 = arith.constant 0.000000e+00 : f32
    %32 = vector.broadcast %cst_15 : f32 to vector<8x128xf32>
    %c127_i32 = arith.constant 127 : i32
    %33 = tpu.dynamic_rotate %26 by %c127_i32 dim 1 : vector<8x128xf32>, i32 -> vector<8x128xf32>
    %34 = vector.shape_cast %20 : vector<1x128xi1> to vector<1x128xi1>
    %35 = vector.broadcast %34 : vector<1x128xi1> to vector<8x128xi1>
    %36 = arith.select %35, %32, %33 : vector<8x128xi1>, vector<8x128xf32>
    %37 = tpu.concatenate %31, %26, %36 in 0 : vector<8x128xf32>, vector<8x128xf32>, vector<8x128xf32> -> vector<24x128xf32>
    %cst_16 = arith.constant dense<0.000000e+00> : vector<8x128xf32>
    %38 = tpu.matmul %21, %37, %cst_16 {dimension_numbers = #tpu.dot_dimension_numbers<[1], [0], [0], [1], [0, 0, 1, 1], [], []>} : vector<8x24xf32>, vector<24x128xf32>, vector<8x128xf32> -> vector<8x128xf32>
    %39 = vector.broadcast %22 : vector<8x1xf32> to vector<8x128xf32>
    %40 = arith.addf %38, %39 : vector<8x128xf32>
    %cst_17 = arith.constant 0.000000e+00 : f32
    %41 = vector.broadcast %cst_17 : f32 to vector<8x128xf32>
    %42 = arith.maximumf %40, %41 : vector<8x128xf32>
    %cst_18 = arith.constant 0.000000e+00 : f32
    %43 = vector.broadcast %cst_18 : f32 to vector<8x128xf32>
    %c1_i32_19 = arith.constant 1 : i32
    %44 = tpu.dynamic_rotate %42 by %c1_i32_19 dim 1 : vector<8x128xf32>, i32 -> vector<8x128xf32>
    %45 = vector.shape_cast %18 : vector<1x128xi1> to vector<1x128xi1>
    %46 = vector.broadcast %45 : vector<1x128xi1> to vector<8x128xi1>
    %47 = arith.select %46, %43, %44 : vector<8x128xi1>, vector<8x128xf32>
    %cst_20 = arith.constant 0.000000e+00 : f32
    %48 = vector.broadcast %cst_20 : f32 to vector<8x128xf32>
    %c127_i32_21 = arith.constant 127 : i32
    %49 = tpu.dynamic_rotate %42 by %c127_i32_21 dim 1 : vector<8x128xf32>, i32 -> vector<8x128xf32>
    %50 = vector.shape_cast %20 : vector<1x128xi1> to vector<1x128xi1>
    %51 = vector.broadcast %50 : vector<1x128xi1> to vector<8x128xi1>
    %52 = arith.select %51, %48, %49 : vector<8x128xi1>, vector<8x128xf32>
    %53 = tpu.concatenate %47, %42, %52 in 0 : vector<8x128xf32>, vector<8x128xf32>, vector<8x128xf32> -> vector<24x128xf32>
    %cst_22 = arith.constant dense<0.000000e+00> : vector<8x128xf32>
    %54 = tpu.matmul %23, %53, %cst_22 {dimension_numbers = #tpu.dot_dimension_numbers<[1], [0], [0], [1], [0, 0, 1, 1], [], []>} : vector<8x24xf32>, vector<24x128xf32>, vector<8x128xf32> -> vector<8x128xf32>
    %55 = vector.broadcast %24 : vector<8x1xf32> to vector<8x128xf32>
    %56 = arith.addf %54, %55 : vector<8x128xf32>
    %cst_23 = arith.constant 0.000000e+00 : f32
    %57 = vector.broadcast %cst_23 : f32 to vector<8x128xf32>
    %58 = arith.maximumf %56, %57 : vector<8x128xf32>
    %c0_24 = arith.constant 0 : index
    %c0_25 = arith.constant 0 : index
    %c0_26 = arith.constant 0 : index
    %59 = vector.load %arg6[%c0_24, %c0_25, %c0_26] : memref<1x8x128xf32, #tpu.memory_space<vmem>>, vector<1x8x128xf32>
    %60 = vector.shape_cast %59 : vector<1x8x128xf32> to vector<8x128xf32>
    %61 = vector.shape_cast %58 : vector<8x128xf32> to vector<1x8x128xf32>
    tpu.vector_store %arg6[%c0_24, %c0_25, %c0_26], %61 {strides = array<i32>} : memref<1x8x128xf32, #tpu.memory_space<vmem>>, vector<1x8x128xf32>,
    return
  }
  func.func @transform_0(%arg0: i32) -> (i32, i32, i32) {
    %c0_i32 = arith.constant 0 : i32
    %c0_i32_0 = arith.constant 0 : i32
    %c0_i32_1 = arith.constant 0 : i32
    return %arg0, %c0_i32, %c0_i32_0 : i32, i32, i32
  }
  func.func @transform_1(%arg0: i32) -> (i32, i32) {
    %c0_i32 = arith.constant 0 : i32
    %c0_i32_0 = arith.constant 0 : i32
    %c0_i32_1 = arith.constant 0 : i32
    return %c0_i32, %c0_i32_0 : i32, i32
  }
  func.func @transform_2(%arg0: i32) -> (i32, i32) {
    %c0_i32 = arith.constant 0 : i32
    %c0_i32_0 = arith.constant 0 : i32
    %c0_i32_1 = arith.constant 0 : i32
    return %c0_i32, %c0_i32_0 : i32, i32
  }
  func.func @transform_3(%arg0: i32) -> (i32, i32) {
    %c0_i32 = arith.constant 0 : i32
    %c0_i32_0 = arith.constant 0 : i32
    %c0_i32_1 = arith.constant 0 : i32
    return %c0_i32, %c0_i32_0 : i32, i32
  }
  func.func @transform_4(%arg0: i32) -> (i32, i32) {
    %c0_i32 = arith.constant 0 : i32
    %c0_i32_0 = arith.constant 0 : i32
    %c0_i32_1 = arith.constant 0 : i32
    return %c0_i32, %c0_i32_0 : i32, i32
  }
  func.func @transform_5(%arg0: i32) -> (i32, i32, i32) {
    %c0_i32 = arith.constant 0 : i32
    %c0_i32_0 = arith.constant 0 : i32
    %c0_i32_1 = arith.constant 0 : i32
    return %arg0, %c0_i32, %c0_i32_0 : i32, i32, i32
  }
}

</mosaic_0001>

<bundles_post_ra>
// kernel: tpu_custom_call.1
= control target key start
LH: loop header
LB: loop body
LE: loop exit
PB: predicated region body
PF: predicated region fallthrough
CT: control target
= control target key end

     0   :  { %10 = vsyncpa [#allocation3], 0  ;;  %s292_s0 = inlined_call_operand.vmem [shape: f32[1,8,128], index: 0, kind: input, shape index: {}]   ;;  %s293_s1 = inlined_call_operand.vmem [shape: f32[8,24], index: 1, kind: input, shape index: {}]   ;;  %s294_s2 = inlined_call_operand.vmem [shape: f32[8,1], index: 2, kind: input, shape index: {}]   ;;  %s295_s3 = inlined_call_operand.hbm [shape: f32[8,24], index: 3, kind: input, shape index: {}]   ;;  %s296_s4 = inlined_call_operand.vmem [shape: f32[8,1], index: 4, kind: input, shape index: {}]   ;;  %s297_s5 = inlined_call_operand.hbm [shape: f32[1,8,128], index: 5, kind: output, shape index: {}]  }
   0x1   :  { %11 = vsyncpa [#allocation4], 0  ;;  %s23_s20 = sshll.u32 %s295_s3, 4  ;;  %s221_s21 = smov [#allocation2]   ;;  %s24_s20 = int_to_ptr.hbm [resolvable:$true] %s23_s20 }
   0x2   :  { %s25_s22 = sshll.u32 %s221_s21, 4  ;;  %s26_s22 = int_to_ptr.vmem [resolvable:$true] %s25_s22 }
   0x3   :  { %28 = dma.hbm_to_vmem [thread:$0]  %s24_s20, 128, %s26_s22, [#allocation3]  }
   0x4   :  { %217 = dma.done.wait [#allocation3], 128  }
   0x5   :  { %218 = vsyncadd [#allocation3], 4294967168  ;;  %v55_v0 = vld [vmem:[%s292_s0] sm:$0xff]  ;;  %s222_s25 = smov 127   ;;  %s223_s26 = smov 1   ;;  %v224_v2 = vmov 0   ;;  %v35_v3 = vlaneseq }
   0x6   :  { %61 = vrot.lane.b32.xlu0 %v55_v0, %s222_s25  ;;  %v52_v1 = vld [vmem:[%s294_s2] sm:$0xff]  ;;  %166 = vset.pattern.permute.xlu1 %v224_v2  ;;  %vm71_vm2 = vcmask 195584  }
   0x7   :  { %167 = vset.pattern.permute.xlu2 %v224_v2  ;;  %68 = vperm.xlu1 %166, %v52_v1   ;;  %v36_v4 = vand.u32 127, %v35_v3  ;;  %v51_v9 = vld [vmem:[%s293_s1] sm:$0xff]  ;;  %s225_s1 = smov [#allocation5]  }
   0x8   :  { %168 = vset.pattern.permute.xlu0 %v224_v2  ;;  %v54_v15 = vld [vmem:[%s296_s4] sm:$0xff]  ;;  %s137_s30 = sshll.u32 %s225_s1, 4  ;;  %s139_s4 = sshll.u32 %s297_s5, 4  ;;  %s138_s30 = int_to_ptr.vmem [resolvable:$true] %s137_s30  ;;  %s140_s4 = int_to_ptr.hbm [resolvable:$true] %s139_s4 }
   0x9   :  { %v41_v5 = vand.u32 15, %v36_v4  ;;  %v53_v17 = vld [vmem:[#allocation2] sm:$0xff] }
   0xb   :  { %vm265_vm0 = vcmp.ne.s32.totalorder %v41_v5, 15  ;;  %vm271_vm1 = vcmp.ne.s32.totalorder %v41_v5, 0 }
   0xe   :  { %56 = vrot.lane.b32.xlu0 %v55_v0, %s223_s26 }
  0x78   :  { %v62_v7 = vpop.permute.xlu0 %61 }
  0x79   :  { %150 = vmatpush.msk.msra.mxu0 %vm265_vm0, %v62_v7  ;;  %v69_v11 = vpop.permute.xlu1 %68 }
  0x7b   :  { %89 = vmatpush.msra.mxu0 %v55_v0 }
  0x80   :  { %v57_v10 = vpop.permute.xlu0 %56 }
  0x81   :  { %152 = vmatpush.msk.msra.mxu0 %vm271_vm1, %v57_v10 }
  0x82   :  { %153 = vmatmul.msk.f32.vlgmr.msra.gmra.mxu0 %vm71_vm2, %v51_v9 }
  0xff   :  { %v92_v12 = vpop.f32.mrf.mxu0 }
 0x100   :  { %v93_v13 = vadd.f32 %v92_v12, %v69_v11 }
 0x102   :  { %v95_v14 = vmax.f32 %v93_v13, 0.0 }
 0x104   :  { %96 = vrot.lane.b32.xlu2 %v95_v14, %s223_s26  ;;  %99 = vrot.lane.b32.xlu1 %v95_v14, %s222_s25 }
 0x10c   :  { %104 = vperm.xlu2 %167, %v54_v15  }
 0x15e   :  { %v97_v18 = vpop.permute.xlu2 %96 }
 0x166   :  { %v105_v19 = vpop.permute.xlu2 %104 }
 0x176   :  { %v100_v16 = vpop.permute.xlu1 %99 }
 0x177   :  { %155 = vmatpush.msk.msra.mxu1 %vm265_vm0, %v100_v16 }
 0x179   :  { %124 = vmatpush.msra.mxu1 %v95_v14 }
 0x17b   :  { %157 = vmatpush.msk.msra.mxu1 %vm271_vm1, %v97_v18 }
 0x17c   :  { %158 = vmatmul.msk.f32.vlgmr.msra.gmra.mxu1 %vm71_vm2, %v53_v17 }
 0x1f9   :  { %v127_v20 = vpop.f32.mrf.mxu1 }
 0x1fa   :  { %v128_v21 = vadd.f32 %v127_v20, %v105_v19 }
 0x1fc   :  { %v130_v22 = vmax.f32 %v128_v21, 0.0 }
 0x1fe   :  { %131 = vst [vmem:[#allocation5] sm:$0xff] %v130_v22 }
 0x1ff   :  { %142 = dma.vmem_to_hbm [thread:$0]  %s138_s30, 128, %s140_s4, [#allocation4]  }
 0x200   :  { %219 = dma.done.wait [#allocation4], 128  }
 0x201   :  { %220 = vsyncadd [#allocation4], 4294967168 }
 0x202   :  { %147 = vsyncpa [#allocation3], 1 }
 0x203   :  { %148 = vsyncpa [#allocation4], 1 }

</bundles_post_ra>
